<compile_context>
chip_gen: v5e
topology: v5e:2x2
jax: 0.10.0
libtpu: 0.0.40
codegen_flags: <defaults>
</compile_context>

<pallas_src>
import functools

import jax
import jax.numpy as jnp
from jax.experimental import pallas as pl
from jax.experimental.pallas import tpu as pltpu


# ----------------------------- helpers ------------------------------------- #

def make_list(v, n):
    return list(v) if isinstance(v, (list, tuple)) else [v] * n


def _round_up_lanes(n, m=128):
    return max(m, ((n + m - 1) // m) * m)


def _apply_activation(y, name):
    if name == "relu":
        return jnp.maximum(y, 0.0)
    if name == "sigmoid":
        return jax.nn.sigmoid(y)
    if name == "leaky_relu":
        return jnp.where(y >= 0, y, 0.01 * y)
    if name == "tanh":
        return jnp.tanh(y)
    raise AssertionError(f"Unknown activation {name}")


def _physical_vmem_bytes():
    try:
        return int(pltpu.get_tpu_info().vmem_capacity_bytes)
    except Exception:
        return 64 << 20          # conservative (v7x per-TC VMEM)


def _choose_batch_tiling(B):
    """Pick (batch_tile, padded_batch): padded_batch % tile == 0, tile % 8 == 0."""
    small_vmem = _physical_vmem_bytes() <= (64 << 20)     # v7x
    candidates = (512, 256, 128) if small_vmem else (1024, 512, 256, 128)
    for tb in candidates:
        if B >= 2 * tb:          # >= 2 grid steps: pipelining + both v7x TCs
            bpad = ((B + tb - 1) // tb) * tb
            return tb, bpad
    if B > 16:                   # moderate batch: two sublane-aligned tiles
        tb = (((B + 1) // 2 + 7) // 8) * 8
        return tb, 2 * tb
    bpad = max(8, ((B + 7) // 8) * 8)                      # tiny batch: one block
    return bpad, bpad


# ------------------------------ kernel ------------------------------------- #

def inception_kernel(*refs, layer_counts, activations, out_mode,
                     br_offsets, br_widths0):
    """Fused forward of all branches on one batch tile.

    refs = (x_ref, w0cat_ref, b0cat_ref, [w, b]*deeper_layers..., o_ref)

    Layer 0 of every branch is one wide lane-dense MXU matmul against the
    column-packed weight w0cat.  Bias + activation are applied per branch
    slice; each branch's tail runs immediately and is accumulated ('add') or
    stored into its own output slab ('cat') right away, keeping the live vreg
    set small.
    """
    x_ref, w0_ref, b0_ref = refs[0], refs[1], refs[2]
    extra = refs[3:-1]
    o_ref = refs[-1]

    # --- fused layer 0 for all branches: one lane-dense matmul ------------- #
    w0 = w0_ref[...]
    y0 = jnp.dot(x_ref[...].astype(w0.dtype), w0,
                 preferred_element_type=jnp.float32)

    # --- per-branch tails, early accumulate / store ------------------------- #
    p = 0
    acc = None
    for b_idx, n_layers in enumerate(layer_counts):
        off = br_offsets[b_idx]
        width = br_widths0[b_idx]
        y = _apply_activation(
            y0[:, off:off + width] + b0_ref[:, off:off + width],
            activations[b_idx])
        for _ in range(n_layers - 1):
            w = extra[p][...]
            bias = extra[p + 1][...]
            p += 2
            y = jnp.dot(y.astype(w.dtype), w,
                        preferred_element_type=jnp.float32) + bias
            y = _apply_activation(y, activations[b_idx])
        if out_mode in ("add", "sum"):
            acc = y if acc is None else acc + y
        else:   # 'cat': store this branch's slab now; no in-kernel concat
            o_ref[b_idx, :, :] = y.astype(o_ref.dtype)

    if out_mode in ("add", "sum"):
        o_ref[...] = acc.astype(o_ref.dtype)


# ----------------------------- wrapper ------------------------------------- #

class InceptionLayerPallas:
    """Parameters + a pallas_call wrapper reproducing InceptionLayer.forward."""

    # Flipped to False if this jax build rejects pipeline_mode=pl.Buffered(1).
    _single_buffer_weights_ok = True

    def __init__(self, n_branches, size, n_layers, d_factors,
                 activations="relu", out="add", key=None,
                 dtype=jnp.float32, compute_dtype=None):
        self.n_branches = n_branches
        self.size = size
        self.n_layers = make_list(n_layers, n_branches)
        self.d_factors = make_list(d_factors, n_branches)
        self.activations = make_list(activations, n_branches)
        self.out = out
        self.dtype = dtype
        # compute_dtype=jnp.bfloat16 hits MXU-native rate on v5e/v6e/v7x
        # (accumulation stays f32, activations on the f32 result); default
        # keeps exact f32 numerics for the tolerance checks below.
        self.compute_dtype = compute_dtype if compute_dtype is not None else dtype

        assert all(n >= 1 for n in self.n_layers), \
            "each branch needs at least one Dense layer"

        if key is None:
            key = jax.random.PRNGKey(0)

        # ---- raw (unpadded) params, nn.Linear-style uniform init ---------- #
        self.raw_params = []           # per branch: list of (w, b) unpadded
        self.branch_out_dims = []
        for b_idx in range(n_branches):
            layers = []
            in_dim = size
            for _ in range(self.n_layers[b_idx]):
                out_dim = int(in_dim // self.d_factors[b_idx])
                key, kw, kb = jax.random.split(key, 3)
                bound = 1.0 / (in_dim ** 0.5)
                w = jax.random.uniform(kw, (in_dim, out_dim), jnp.float32,
                                       minval=-bound, maxval=bound)
                b = jax.random.uniform(kb, (1, out_dim), jnp.float32,
                                       minval=-bound, maxval=bound)
                layers.append((w, b))
                in_dim = out_dim
            self.raw_params.append(layers)
            self.branch_out_dims.append(in_dim)

        assert len(set(self.branch_out_dims)) == 1, \
            "all branches must end at the same width (required for add/cat)"
        self.out_dim = self.branch_out_dims[0]

        # ---- padded / packed params for the kernel ------------------------ #
        # Every layer's output width is zero-padded to >=128 (lane-dense);
        # padded input ROWS of deeper layers are zero, so activation values in
        # padded lanes (e.g. sigmoid(0)=0.5) never leak into real outputs.
        # This zero-row padding is a load-bearing invariant.
        cdt = self.compute_dtype
        w0_cols, b0_cols = [], []
        self.br_offsets, self.br_widths0 = [], []
        self.deep_params = []          # flat [w, b, ...] for layers >= 1
        off = 0
        for b_idx in range(n_branches):
            layers = self.raw_params[b_idx]
            # layer 0 (fused across branches)
            w, b = layers[0]
            in_dim, out_dim = w.shape
            p_out = _round_up_lanes(out_dim)
            w_pad = jnp.zeros((in_dim, p_out), jnp.float32).at[:, :out_dim].set(w)
            b_pad = jnp.zeros((1, p_out), jnp.float32).at[:, :out_dim].set(b)
            w0_cols.append(w_pad.astype(cdt))
            b0_cols.append(b_pad)                       # bias stays f32
            self.br_offsets.append(off)
            self.br_widths0.append(p_out)
            off += p_out
            # deeper layers (kept per branch: K dims differ across branches)
            p_in = p_out
            for (w, b) in layers[1:]:
                in_dim, out_dim = w.shape
                p_out = _round_up_lanes(out_dim)
                w_pad = (jnp.zeros((p_in, p_out), jnp.float32)
                         .at[:in_dim, :out_dim].set(w))
                b_pad = jnp.zeros((1, p_out), jnp.float32).at[:, :out_dim].set(b)
                self.deep_params.extend([w_pad.astype(cdt), b_pad])
                p_in = p_out
        self.w0_cat = jnp.concatenate(w0_cols, axis=1)   # (size, sum_padded_N)
        self.b0_cat = jnp.concatenate(b0_cols, axis=1)
        self.padded_out = _round_up_lanes(self.out_dim)

    # ---- VMEM budget: single-buffered weights + double-buffered x/out ----- #
    def _vmem_limit_bytes(self, TB, F, P):
        w_bytes = (self.w0_cat.size * self.w0_cat.dtype.itemsize
                   + self.b0_cat.size * self.b0_cat.dtype.itemsize)
        for p in self.deep_params:
            w_bytes += p.size * p.dtype.itemsize
        x_bytes = TB * F * 4
        o_slabs = self.n_branches if self.out not in ("add", "sum") else 1
        o_bytes = o_slabs * TB * P * 4
        # 2x weights: headroom in case the single-buffer request is rejected.
        est = 2 * w_bytes + 2 * x_bytes + 2 * o_bytes + (8 << 20)
        cap = int(0.75 * _physical_vmem_bytes())          # ~48 MiB on v7x
        return int(max(32 << 20, min(est, cap)))

    def _build_call(self, TB, num_tiles, B_pad, F, P, out_dtype,
                    single_buffer_weights):
        kernel = functools.partial(
            inception_kernel,
            layer_counts=tuple(self.n_layers),
            activations=tuple(self.activations),
            out_mode=self.out,
            br_offsets=tuple(self.br_offsets),
            br_widths0=tuple(self.br_widths0),
        )

        w_kwargs = {}
        if single_buffer_weights and hasattr(pl, "Buffered"):
            # Constant index_map -> second pipeline buffer is pure VMEM waste.
            w_kwargs = {"pipeline_mode": pl.Buffered(1)}

        def resident(shape):
            return pl.BlockSpec(shape, lambda i: (0, 0), **w_kwargs)

        # Inputs: x tiled over batch; weights resident (same block every step).
        in_specs = [pl.BlockSpec((TB, F), lambda i: (i, 0)),
                    resident(self.w0_cat.shape),
                    resident(self.b0_cat.shape)]
        in_specs += [resident(p.shape) for p in self.deep_params]

        if self.out in ("add", "sum"):
            out_shape = jax.ShapeDtypeStruct((B_pad, P), out_dtype)
            out_spec = pl.BlockSpec((TB, P), lambda i: (i, 0))
        else:   # 'cat': one slab per branch, flattened to dim-0 concat afterwards
            out_shape = jax.ShapeDtypeStruct((self.n_branches, B_pad, P), out_dtype)
            out_spec = pl.BlockSpec((self.n_branches, TB, P), lambda i: (0, i, 0))

        # NOTE(large size): if the packed weights alone exceed the VMEM budget,
        # add an "arbitrary" grid axis over w0_cat's packed-N columns to stream
        # weight slabs instead of keeping everything resident.
        return pl.pallas_call(
            kernel,
            out_shape=out_shape,
            grid_spec=pltpu.PrefetchScalarGridSpec(
                num_scalar_prefetch=0,
                grid=(num_tiles,),
                in_specs=in_specs,
                out_specs=out_spec,
            ),
            compiler_params=pltpu.CompilerParams(
                dimension_semantics=("parallel",),
                vmem_limit_bytes=self._vmem_limit_bytes(TB, F, P)),
        )

    def __call__(self, x):
        B, F = x.shape
        assert F == self.size
        P = self.padded_out

        TB, B_pad = _choose_batch_tiling(B)
        num_tiles = B_pad // TB

        # Pad the batch (zeros) instead of one huge block for ragged B;
        # x is passed in its original dtype and cast on the VPU in-kernel.
        x_in = x if B_pad == B else (
            jnp.zeros((B_pad, F), x.dtype).at[:B, :].set(x))

        args = (x_in, self.w0_cat, self.b0_cat, *self.deep_params)
        out_dtype = x.dtype

        use_sb = InceptionLayerPallas._single_buffer_weights_ok
        try:
            y = self._build_call(TB, num_tiles, B_pad, F, P, out_dtype,
                                 single_buffer_weights=use_sb)(*args)
        except Exception:
            if not use_sb:
                raise
            # pl.Buffered(1) unsupported on this jax build: fall back.
            InceptionLayerPallas._single_buffer_weights_ok = False
            y = self._build_call(TB, num_tiles, B_pad, F, P, out_dtype,
                                 single_buffer_weights=False)(*args)

        # Strip batch / lane padding (and flatten branch axis for 'cat').
        if self.out in ("add", "sum"):
            return y[:B, :self.out_dim]
        return y[:, :B, :self.out_dim].reshape(self.n_branches * B, self.out_dim)

    # pure-JAX reference (unpadded weights) for correctness checking
    def reference(self, x):
        outs = []
        xf = x.astype(jnp.float32)
        for b_idx in range(self.n_branches):
            y = xf
            for (w, b) in self.raw_params[b_idx]:
                y = _apply_activation(y @ w + b, self.activations[b_idx])
            outs.append(y)
        if self.out in ("add", "sum"):
            return sum(outs).astype(x.dtype)
        return jnp.concatenate(outs, axis=0).astype(x.dtype)


# ------------------------------- main -------------------------------------- #

if __name__ == "__main__":
    key = jax.random.PRNGKey(0)
    key, kx, kx2, kp = jax.random.split(key, 4)

    # InceptionLayer(n_branches=3, size=32, n_layers=[1,2,1], d_factors=[4,2,4],
    #                activations='relu', bns=False, out='add')
    batch, size = 8, 32
    layer = InceptionLayerPallas(
        n_branches=3, size=size, n_layers=[1, 2, 1], d_factors=[4, 2, 4],
        activations="relu", out="add", key=kp, dtype=jnp.float32,
    )

    x = jax.random.normal(kx, (batch, size), jnp.float32)

    y = jax.block_until_ready(layer(x))
    y_ref = layer.reference(x)
    assert y.shape == y_ref.shape, (y.shape, y_ref.shape)
    assert jnp.allclose(y, y_ref, atol=1e-5, rtol=1e-5), \
        float(jnp.max(jnp.abs(y - y_ref)))

    # 'cat' mode (branch outputs stacked on dim 0, matching the torch module)
    layer_cat = InceptionLayerPallas(
        n_branches=3, size=size, n_layers=[1, 2, 1], d_factors=[4, 2, 4],
        activations="relu", out="cat", key=kp, dtype=jnp.float32,
    )
    yc = jax.block_until_ready(layer_cat(x))
    yc_ref = layer_cat.reference(x)
    assert yc.shape == yc_ref.shape, (yc.shape, yc_ref.shape)
    assert jnp.allclose(yc, yc_ref, atol=1e-5, rtol=1e-5), \
        float(jnp.max(jnp.abs(yc - yc_ref)))

    # ragged batch -> exercises batch padding + multi-tile (2-step) grid
    x2 = jax.random.normal(kx2, (40, size), jnp.float32)
    y2 = jax.block_until_ready(layer(x2))
    y2_ref = layer.reference(x2)
    assert y2.shape == y2_ref.shape, (y2.shape, y2_ref.shape)
    assert jnp.allclose(y2, y2_ref, atol=1e-5, rtol=1e-5), \
        float(jnp.max(jnp.abs(y2 - y2_ref)))

    print("KERNEL_OK")
</pallas_src>

<mosaic_0001>
module attributes {stable_mosaic.version = 11 : i64} {
  func.func @inception_kernel(%arg0: i32, %arg1: memref<8x32xf32, #tpu.memory_space<vmem>>, %arg2: memref<32x384xf32, #tpu.memory_space<vmem>>, %arg3: memref<1x384xf32, #tpu.memory_space<vmem>>, %arg4: memref<128x128xf32, #tpu.memory_space<vmem>>, %arg5: memref<1x128xf32, #tpu.memory_space<vmem>>, %arg6: memref<8x128xf32, #tpu.memory_space<vmem>>) attributes {dimension_semantics = [#tpu.dimension_semantics<parallel>], iteration_bounds = array<i64: 1>, scalar_prefetch = 0 : i64, scratch_operands = 0 : i64, tpu.core_type = #tpu.core_type<tc>, window_params = [{transform_indices = @transform_0, window_bounds = array<i64: 8, 32>}, {pipeline_mode = #tpu.pipeline_mode<synchronous>, transform_indices = @transform_1, window_bounds = array<i64: 32, 384>}, {pipeline_mode = #tpu.pipeline_mode<synchronous>, transform_indices = @transform_2, window_bounds = array<i64: 1, 384>}, {pipeline_mode = #tpu.pipeline_mode<synchronous>, transform_indices = @transform_3, window_bounds = array<i64: 128, 128>}, {pipeline_mode = #tpu.pipeline_mode<synchronous>, transform_indices = @transform_4, window_bounds = array<i64: 1, 128>}, {transform_indices = @transform_5, window_bounds = array<i64: 8, 128>}]} {
    %c0 = arith.constant 0 : index
    %c0_0 = arith.constant 0 : index
    %0 = vector.load %arg2[%c0, %c0_0] : memref<32x384xf32, #tpu.memory_space<vmem>>, vector<32x384xf32>
    %c0_1 = arith.constant 0 : index
    %c0_2 = arith.constant 0 : index
    %1 = vector.load %arg1[%c0_1, %c0_2] : memref<8x32xf32, #tpu.memory_space<vmem>>, vector<8x32xf32>
    %cst = arith.constant dense<0.000000e+00> : vector<8x384xf32>
    %2 = tpu.matmul %1, %0, %cst {dimension_numbers = #tpu.dot_dimension_numbers<[1], [0], [0], [1], [0, 0, 1, 1], [], []>} : vector<8x32xf32>, vector<32x384xf32>, vector<8x384xf32> -> vector<8x384xf32>
    %3 = vector.extract_strided_slice %2 {offsets = [0, 0], sizes = [8, 128], strides = [1, 1]} : vector<8x384xf32> to vector<8x128xf32>
    %c0_3 = arith.constant 0 : index
    %c0_4 = arith.constant 0 : index
    %4 = vector.load %arg3[%c0_3, %c0_4] : memref<1x384xf32, #tpu.memory_space<vmem>>, vector<1x128xf32>
    %5 = vector.broadcast %4 : vector<1x128xf32> to vector<8x128xf32>
    %6 = arith.addf %3, %5 : vector<8x128xf32>
    %cst_5 = arith.constant 0.000000e+00 : f32
    %7 = vector.broadcast %cst_5 : f32 to vector<8x128xf32>
    %8 = arith.maximumf %6, %7 : vector<8x128xf32>
    %9 = vector.extract_strided_slice %2 {offsets = [0, 128], sizes = [8, 128], strides = [1, 1]} : vector<8x384xf32> to vector<8x128xf32>
    %c0_6 = arith.constant 0 : index
    %c128 = arith.constant 128 : index
    %10 = vector.load %arg3[%c0_6, %c128] : memref<1x384xf32, #tpu.memory_space<vmem>>, vector<1x128xf32>
    %11 = vector.broadcast %10 : vector<1x128xf32> to vector<8x128xf32>
    %12 = arith.addf %9, %11 : vector<8x128xf32>
    %cst_7 = arith.constant 0.000000e+00 : f32
    %13 = vector.broadcast %cst_7 : f32 to vector<8x128xf32>
    %14 = arith.maximumf %12, %13 : vector<8x128xf32>
    %c0_8 = arith.constant 0 : index
    %c0_9 = arith.constant 0 : index
    %15 = vector.load %arg4[%c0_8, %c0_9] : memref<128x128xf32, #tpu.memory_space<vmem>>, vector<128x128xf32>
    %c0_10 = arith.constant 0 : index
    %c0_11 = arith.constant 0 : index
    %16 = vector.load %arg5[%c0_10, %c0_11] : memref<1x128xf32, #tpu.memory_space<vmem>>, vector<1x128xf32>
    %cst_12 = arith.constant dense<0.000000e+00> : vector<8x128xf32>
    %17 = tpu.matmul %14, %15, %cst_12 {dimension_numbers = #tpu.dot_dimension_numbers<[1], [0], [0], [1], [0, 0, 1, 1], [], []>} : vector<8x128xf32>, vector<128x128xf32>, vector<8x128xf32> -> vector<8x128xf32>
    %18 = vector.broadcast %16 : vector<1x128xf32> to vector<8x128xf32>
    %19 = arith.addf %17, %18 : vector<8x128xf32>
    %cst_13 = arith.constant 0.000000e+00 : f32
    %20 = vector.broadcast %cst_13 : f32 to vector<8x128xf32>
    %21 = arith.maximumf %19, %20 : vector<8x128xf32>
    %22 = arith.addf %8, %21 : vector<8x128xf32>
    %23 = vector.extract_strided_slice %2 {offsets = [0, 256], sizes = [8, 128], strides = [1, 1]} : vector<8x384xf32> to vector<8x128xf32>
    %c0_14 = arith.constant 0 : index
    %c256 = arith.constant 256 : index
    %24 = vector.load %arg3[%c0_14, %c256] : memref<1x384xf32, #tpu.memory_space<vmem>>, vector<1x128xf32>
    %25 = vector.broadcast %24 : vector<1x128xf32> to vector<8x128xf32>
    %26 = arith.addf %23, %25 : vector<8x128xf32>
    %cst_15 = arith.constant 0.000000e+00 : f32
    %27 = vector.broadcast %cst_15 : f32 to vector<8x128xf32>
    %28 = arith.maximumf %26, %27 : vector<8x128xf32>
    %29 = arith.addf %22, %28 : vector<8x128xf32>
    %c0_16 = arith.constant 0 : index
    %c0_17 = arith.constant 0 : index
    %30 = vector.load %arg6[%c0_16, %c0_17] : memref<8x128xf32, #tpu.memory_space<vmem>>, vector<8x128xf32>
    tpu.vector_store %arg6[%c0_16, %c0_17], %29 {strides = array<i32>} : memref<8x128xf32, #tpu.memory_space<vmem>>, vector<8x128xf32>,
    return
  }
  func.func @transform_0(%arg0: i32) -> (i32, i32) {
    %c0_i32 = arith.constant 0 : i32
    %c0_i32_0 = arith.constant 0 : i32
    return %arg0, %c0_i32 : i32, i32
  }
  func.func @transform_1(%arg0: i32) -> (i32, i32) {
    %c0_i32 = arith.constant 0 : i32
    %c0_i32_0 = arith.constant 0 : i32
    %c0_i32_1 = arith.constant 0 : i32
    return %c0_i32, %c0_i32_0 : i32, i32
  }
  func.func @transform_2(%arg0: i32) -> (i32, i32) {
    %c0_i32 = arith.constant 0 : i32
    %c0_i32_0 = arith.constant 0 : i32
    %c0_i32_1 = arith.constant 0 : i32
    return %c0_i32, %c0_i32_0 : i32, i32
  }
  func.func @transform_3(%arg0: i32) -> (i32, i32) {
    %c0_i32 = arith.constant 0 : i32
    %c0_i32_0 = arith.constant 0 : i32
    %c0_i32_1 = arith.constant 0 : i32
    return %c0_i32, %c0_i32_0 : i32, i32
  }
  func.func @transform_4(%arg0: i32) -> (i32, i32) {
    %c0_i32 = arith.constant 0 : i32
    %c0_i32_0 = arith.constant 0 : i32
    %c0_i32_1 = arith.constant 0 : i32
    return %c0_i32, %c0_i32_0 : i32, i32
  }
  func.func @transform_5(%arg0: i32) -> (i32, i32) {
    %c0_i32 = arith.constant 0 : i32
    %c0_i32_0 = arith.constant 0 : i32
    return %arg0, %c0_i32 : i32, i32
  }
}

module attributes {stable_mosaic.version = 11 : i64} {
  func.func @inception_kernel(%arg0: i32, %arg1: memref<8x32xf32, #tpu.memory_space<vmem>>, %arg2: memref<32x384xf32, #tpu.memory_space<vmem>>, %arg3: memref<1x384xf32, #tpu.memory_space<vmem>>, %arg4: memref<128x128xf32, #tpu.memory_space<vmem>>, %arg5: memref<1x128xf32, #tpu.memory_space<vmem>>, %arg6: memref<8x128xf32, #tpu.memory_space<vmem>>) attributes {dimension_semantics = [#tpu.dimension_semantics<parallel>], iteration_bounds = array<i64: 1>, scalar_prefetch = 0 : i64, scratch_operands = 0 : i64, tpu.core_type = #tpu.core_type<tc>, window_params = [{transform_indices = @transform_0, window_bounds = array<i64: 8, 32>}, {pipeline_mode = #tpu.pipeline_mode<synchronous>, transform_indices = @transform_1, window_bounds = array<i64: 32, 384>}, {pipeline_mode = #tpu.pipeline_mode<synchronous>, transform_indices = @transform_2, window_bounds = array<i64: 1, 384>}, {pipeline_mode = #tpu.pipeline_mode<synchronous>, transform_indices = @transform_3, window_bounds = array<i64: 128, 128>}, {pipeline_mode = #tpu.pipeline_mode<synchronous>, transform_indices = @transform_4, window_bounds = array<i64: 1, 128>}, {transform_indices = @transform_5, window_bounds = array<i64: 8, 128>}]} {
    %c0 = arith.constant 0 : index
    %c0_0 = arith.constant 0 : index
    %0 = vector.load %arg2[%c0, %c0_0] : memref<32x384xf32, #tpu.memory_space<vmem>>, vector<32x384xf32>
    %c0_1 = arith.constant 0 : index
    %c0_2 = arith.constant 0 : index
    %1 = vector.load %arg1[%c0_1, %c0_2] : memref<8x32xf32, #tpu.memory_space<vmem>>, vector<8x32xf32>
    %cst = arith.constant dense<0.000000e+00> : vector<8x384xf32>
    %2 = tpu.matmul %1, %0, %cst {dimension_numbers = #tpu.dot_dimension_numbers<[1], [0], [0], [1], [0, 0, 1, 1], [], []>} : vector<8x32xf32>, vector<32x384xf32>, vector<8x384xf32> -> vector<8x384xf32>
    %3 = vector.extract_strided_slice %2 {offsets = [0, 0], sizes = [8, 128], strides = [1, 1]} : vector<8x384xf32> to vector<8x128xf32>
    %c0_3 = arith.constant 0 : index
    %c0_4 = arith.constant 0 : index
    %4 = vector.load %arg3[%c0_3, %c0_4] : memref<1x384xf32, #tpu.memory_space<vmem>>, vector<1x128xf32>
    %5 = vector.broadcast %4 : vector<1x128xf32> to vector<8x128xf32>
    %6 = arith.addf %3, %5 : vector<8x128xf32>
    %cst_5 = arith.constant 0.000000e+00 : f32
    %7 = vector.broadcast %cst_5 : f32 to vector<8x128xf32>
    %8 = arith.maximumf %6, %7 : vector<8x128xf32>
    %9 = vector.extract_strided_slice %2 {offsets = [0, 128], sizes = [8, 128], strides = [1, 1]} : vector<8x384xf32> to vector<8x128xf32>
    %c0_6 = arith.constant 0 : index
    %c128 = arith.constant 128 : index
    %10 = vector.load %arg3[%c0_6, %c128] : memref<1x384xf32, #tpu.memory_space<vmem>>, vector<1x128xf32>
    %11 = vector.broadcast %10 : vector<1x128xf32> to vector<8x128xf32>
    %12 = arith.addf %9, %11 : vector<8x128xf32>
    %cst_7 = arith.constant 0.000000e+00 : f32
    %13 = vector.broadcast %cst_7 : f32 to vector<8x128xf32>
    %14 = arith.maximumf %12, %13 : vector<8x128xf32>
    %c0_8 = arith.constant 0 : index
    %c0_9 = arith.constant 0 : index
    %15 = vector.load %arg4[%c0_8, %c0_9] : memref<128x128xf32, #tpu.memory_space<vmem>>, vector<128x128xf32>
    %c0_10 = arith.constant 0 : index
    %c0_11 = arith.constant 0 : index
    %16 = vector.load %arg5[%c0_10, %c0_11] : memref<1x128xf32, #tpu.memory_space<vmem>>, vector<1x128xf32>
    %cst_12 = arith.constant dense<0.000000e+00> : vector<8x128xf32>
    %17 = tpu.matmul %14, %15, %cst_12 {dimension_numbers = #tpu.dot_dimension_numbers<[1], [0], [0], [1], [0, 0, 1, 1], [], []>} : vector<8x128xf32>, vector<128x128xf32>, vector<8x128xf32> -> vector<8x128xf32>
    %18 = vector.broadcast %16 : vector<1x128xf32> to vector<8x128xf32>
    %19 = arith.addf %17, %18 : vector<8x128xf32>
    %cst_13 = arith.constant 0.000000e+00 : f32
    %20 = vector.broadcast %cst_13 : f32 to vector<8x128xf32>
    %21 = arith.maximumf %19, %20 : vector<8x128xf32>
    %22 = arith.addf %8, %21 : vector<8x128xf32>
    %23 = vector.extract_strided_slice %2 {offsets = [0, 256], sizes = [8, 128], strides = [1, 1]} : vector<8x384xf32> to vector<8x128xf32>
    %c0_14 = arith.constant 0 : index
    %c256 = arith.constant 256 : index
    %24 = vector.load %arg3[%c0_14, %c256] : memref<1x384xf32, #tpu.memory_space<vmem>>, vector<1x128xf32>
    %25 = vector.broadcast %24 : vector<1x128xf32> to vector<8x128xf32>
    %26 = arith.addf %23, %25 : vector<8x128xf32>
    %cst_15 = arith.constant 0.000000e+00 : f32
    %27 = vector.broadcast %cst_15 : f32 to vector<8x128xf32>
    %28 = arith.maximumf %26, %27 : vector<8x128xf32>
    %29 = arith.addf %22, %28 : vector<8x128xf32>
    %c0_16 = arith.constant 0 : index
    %c0_17 = arith.constant 0 : index
    %30 = vector.load %arg6[%c0_16, %c0_17] : memref<8x128xf32, #tpu.memory_space<vmem>>, vector<8x128xf32>
    tpu.vector_store %arg6[%c0_16, %c0_17], %29 {strides = array<i32>} : memref<8x128xf32, #tpu.memory_space<vmem>>, vector<8x128xf32>,
    return
  }
  func.func @transform_0(%arg0: i32) -> (i32, i32) {
    %c0_i32 = arith.constant 0 : i32
    %c0_i32_0 = arith.constant 0 : i32
    return %arg0, %c0_i32 : i32, i32
  }
  func.func @transform_1(%arg0: i32) -> (i32, i32) {
    %c0_i32 = arith.constant 0 : i32
    %c0_i32_0 = arith.constant 0 : i32
    %c0_i32_1 = arith.constant 0 : i32
    return %c0_i32, %c0_i32_0 : i32, i32
  }
  func.func @transform_2(%arg0: i32) -> (i32, i32) {
    %c0_i32 = arith.constant 0 : i32
    %c0_i32_0 = arith.constant 0 : i32
    %c0_i32_1 = arith.constant 0 : i32
    return %c0_i32, %c0_i32_0 : i32, i32
  }
  func.func @transform_3(%arg0: i32) -> (i32, i32) {
    %c0_i32 = arith.constant 0 : i32
    %c0_i32_0 = arith.constant 0 : i32
    %c0_i32_1 = arith.constant 0 : i32
    return %c0_i32, %c0_i32_0 : i32, i32
  }
  func.func @transform_4(%arg0: i32) -> (i32, i32) {
    %c0_i32 = arith.constant 0 : i32
    %c0_i32_0 = arith.constant 0 : i32
    %c0_i32_1 = arith.constant 0 : i32
    return %c0_i32, %c0_i32_0 : i32, i32
  }
  func.func @transform_5(%arg0: i32) -> (i32, i32) {
    %c0_i32 = arith.constant 0 : i32
    %c0_i32_0 = arith.constant 0 : i32
    return %arg0, %c0_i32 : i32, i32
  }
}

</mosaic_0001>

<bundles_post_ra>
// kernel: tpu_custom_call.1
= control target key start
LH: loop header
LB: loop body
LE: loop exit
PB: predicated region body
PF: predicated region fallthrough
CT: control target
= control target key end

     0   :  { %10 = vsyncpa [#allocation3], 0  ;;  %s442_s0 = inlined_call_operand.hbm [shape: f32[8,32], index: 0, kind: input, shape index: {}]   ;;  %s443_s1 = inlined_call_operand.hbm [shape: f32[32,384], index: 1, kind: input, shape index: {}]   ;;  %s444_s2 = inlined_call_operand.hbm [shape: f32[1,384], index: 2, kind: input, shape index: {}]   ;;  %s445_s3 = inlined_call_operand.hbm [shape: f32[128,128], index: 3, kind: input, shape index: {}]   ;;  %s446_s4 = inlined_call_operand.vmem [shape: f32[1,128], index: 4, kind: input, shape index: {}]   ;;  %s447_s5 = inlined_call_operand.hbm [shape: f32[8,128], index: 5, kind: output, shape index: {}]  }
   0x1   :  { %11 = vsyncpa [#allocation6], 0 }
   0x2   :  { %12 = vsyncpa [#allocation9], 0  ;;  %s29_s20 = sshll.u32 %s443_s1, 4  ;;  %s30_s20 = int_to_ptr.hbm [resolvable:$true] %s29_s20 }
   0x3   :  { %13 = vsyncpa [#allocation4], 0  ;;  %s382_s21 = smov [#allocation5]   ;;  %s19_s25 = sshll.u32 %s442_s0, 4  ;;  %s20_s25 = int_to_ptr.hbm [resolvable:$true] %s19_s25 }
   0x4   :  { %s31_s22 = sshll.u32 %s382_s21, 4  ;;  %s383_s26 = smov 384   ;;  %s32_s22 = int_to_ptr.vmem [resolvable:$true] %s31_s22 }
   0x5   :  { %s384_s27 = smov 24   ;;  %s385_s28 = smov [#allocation2]  }
   0x6   :  { %37 = dma.hbm_to_vmem [thread:$0]  %s30_s20, 1536, %s32_s22, [#allocation6], %s383_s26, %s383_s26, %s384_s27  }
   0x7   :  { %s21_s29 = sshll.u32 %s385_s28, 4  ;;  %s43_s7 = sshll.u32 %s444_s2, 4  ;;  %s22_s29 = int_to_ptr.vmem [resolvable:$true] %s21_s29  ;;  %s44_s7 = int_to_ptr.hbm [resolvable:$true] %s43_s7 }
   0x8   :  { %24 = dma.hbm_to_vmem [thread:$0]  %s20_s25, 128, %s22_s29, [#allocation3]  }
   0x9   :  { %s53_s9 = sshll.u32 %s445_s3, 4  ;;  %s386_s10 = smov [#allocation7]   ;;  %s54_s9 = int_to_ptr.hbm [resolvable:$true] %s53_s9 }
   0xa   :  { %s45_s11 = sshll.u32 %s386_s10, 4  ;;  %s387_s0 = smov [#allocation8]   ;;  %s46_s11 = int_to_ptr.vmem [resolvable:$true] %s45_s11 }
   0xb   :  { %48 = dma.hbm_to_vmem [thread:$0]  %s44_s7, 48, %s46_s11, [#allocation6]  }
   0xc   :  { %s55_s12 = sshll.u32 %s387_s0, 4  ;;  %s388_s13 = smov 128   ;;  %s56_s12 = int_to_ptr.vmem [resolvable:$true] %s55_s12 }
   0xd   :  { %s389_s14 = smov 8  }
   0xe   :  { %61 = dma.hbm_to_vmem [thread:$0]  %s54_s9, 2048, %s56_s12, [#allocation9], %s388_s13, %s388_s13, %s389_s14  }
   0xf   :  { %374 = dma.done.wait [#allocation3], 128  }
  0x10   :  { %375 = vsyncadd [#allocation3], 4294967168 }
  0x11   :  { %376 = dma.done.wait [#allocation6], 1584  }
  0x12   :  { %377 = vsyncadd [#allocation6], 4294965712 }
  0x13   :  { %378 = dma.done.wait [#allocation9], 2048  }
  0x14   :  { %379 = vsyncadd [#allocation9], 4294965248  ;;  %v90_v0 = vld [vmem:[#allocation5 + $0x50] sm:$0xff]  ;;  %v87_v1 = vld [vmem:[#allocation5 + $0x38] sm:$0xff]  ;;  %vm93_vm0 = vcmask 261120   ;;  %s390_s15 = smov [#allocation10]  }
  0x15   :  { %129 = vmatpush.msra.mxu1 %v90_v0  ;;  %v184_v2 = vld [vmem:[#allocation8 + $0x78] sm:$0xff]  ;;  %v183_v4 = vld [vmem:[#allocation8 + $0x70] sm:$0xff]  ;;  %v182_v5 = vld [vmem:[#allocation8 + $0x68] sm:$0xff]  ;;  %s224_s16 = sshll.u32 %s390_s15, 4  ;;  %s226_s19 = sshll.u32 %s447_s5, 4  ;;  %s225_s16 = int_to_ptr.vmem [resolvable:$true] %s224_s16  ;;  %s227_s19 = int_to_ptr.hbm [resolvable:$true] %s226_s19 }
  0x16   :  { %v84_v3 = vld [vmem:[#allocation5 + $0x20] sm:$0xff]  ;;  %189 = vmatpush.msra.mxu3 %v184_v2  ;;  %v81_v6 = vld [vmem:[#allocation5 + $0x8] sm:$0xff]  ;;  %v92_v7 = vld [vmem:[#allocation2] sm:$0xff] }
  0x17   :  { %130 = vmatpush.msra.mxu1 %v87_v1  ;;  %v181_v8 = vld [vmem:[#allocation8 + $0x60] sm:$0xff]  ;;  %v180_v9 = vld [vmem:[#allocation8 + $0x58] sm:$0xff]  ;;  %v179_v10 = vld [vmem:[#allocation8 + $0x50] sm:$0xff] }
  0x18   :  { %190 = vmatpush.msra.mxu3 %v183_v4  ;;  %v178_v11 = vld [vmem:[#allocation8 + $0x48] sm:$0xff]  ;;  %v177_v12 = vld [vmem:[#allocation8 + $0x40] sm:$0xff]  ;;  %v176_v13 = vld [vmem:[#allocation8 + $0x38] sm:$0xff] }
  0x19   :  { %131 = vmatpush.msra.mxu1 %v84_v3  ;;  %v175_v14 = vld [vmem:[#allocation8 + $0x30] sm:$0xff]  ;;  %v174_v15 = vld [vmem:[#allocation8 + $0x28] sm:$0xff]  ;;  %v173_v16 = vld [vmem:[#allocation8 + $0x20] sm:$0xff] }
  0x1a   :  { %191 = vmatpush.msra.mxu3 %v182_v5  ;;  %v172_v17 = vld [vmem:[#allocation8 + $0x18] sm:$0xff]  ;;  %v171_v19 = vld [vmem:[#allocation8 + $0x10] sm:$0xff]  ;;  %v170_v21 = vld [vmem:[#allocation8 + $0x8] sm:$0xff] }
  0x1b   :  { %132 = vmatpush.msra.mxu1 %v81_v6  ;;  %v91_v18 = vld [vmem:[#allocation5 + $0x58] sm:$0xff]  ;;  %v88_v20 = vld [vmem:[#allocation5 + $0x40] sm:$0xff]  ;;  %v89_v22 = vld [vmem:[#allocation5 + $0x48] sm:$0xff] }
  0x1c   :  { %239 = vmatmul.msk.f32.vlgmr.msra.gmra.mxu1 %vm93_vm0, %v92_v7  ;;  %192 = vmatpush.msra.mxu3 %v181_v8  ;;  %v85_v23 = vld [vmem:[#allocation5 + $0x28] sm:$0xff]  ;;  %v86_v25 = vld [vmem:[#allocation5 + $0x30] sm:$0xff]  ;;  %v83_v27 = vld [vmem:[#allocation5 + $0x18] sm:$0xff] }
  0x1d   :  { %149 = vmatpush.msra.mxu2 %v91_v18  ;;  %v169_v24 = vld [vmem:[#allocation8] sm:$0xff]  ;;  %109 = vmatpush.msra.mxu0 %v89_v22  ;;  %v82_v26 = vld [vmem:[#allocation5 + $0x10] sm:$0xff]  ;;  %v250_v29 = vld [vmem:[#allocation7 + $0x1] ss:$0 sm:$0xff] }
  0x1e   :  { %193 = vmatpush.msra.mxu3 %v180_v9  ;;  %v80_v28 = vld [vmem:[#allocation5] sm:$0xff]  ;;  %v252_v38 = vld [vmem:[%s446_s4] ss:$0 sm:$0xff] }
  0x1f   :  { %150 = vmatpush.msra.mxu2 %v88_v20  ;;  %110 = vmatpush.msra.mxu0 %v86_v25  ;;  %v251_v33 = vld [vmem:[#allocation7] ss:$0 sm:$0xff]  ;;  %v253_v35 = vld [vmem:[#allocation7 + $0x2] ss:$0 sm:$0xff] }
  0x20   :  { %194 = vmatpush.msra.mxu3 %v179_v10 }
  0x21   :  { %151 = vmatpush.msra.mxu2 %v85_v23  ;;  %111 = vmatpush.msra.mxu0 %v83_v27 }
  0x22   :  { %195 = vmatpush.msra.mxu3 %v178_v11 }
  0x23   :  { %152 = vmatpush.msra.mxu2 %v82_v26  ;;  %112 = vmatpush.msra.mxu0 %v80_v28 }
  0x24   :  { %196 = vmatpush.msra.mxu3 %v177_v12  ;;  %240 = vmatmul.msk.f32.vlgmr.msra.gmra.mxu2 %vm93_vm0, %v92_v7 }
  0x25   :  { %238 = vmatmul.msk.f32.vlgmr.msra.gmra.mxu0 %vm93_vm0, %v92_v7 }
  0x26   :  { %197 = vmatpush.msra.mxu3 %v176_v13 }
  0x28   :  { %198 = vmatpush.msra.mxu3 %v175_v14 }
  0x2a   :  { %199 = vmatpush.msra.mxu3 %v174_v15 }
  0x2c   :  { %200 = vmatpush.msra.mxu3 %v173_v16 }
  0x2e   :  { %201 = vmatpush.msra.mxu3 %v172_v17 }
  0x30   :  { %202 = vmatpush.msra.mxu3 %v171_v19 }
  0x32   :  { %203 = vmatpush.msra.mxu3 %v170_v21 }
  0x34   :  { %204 = vmatpush.msra.mxu3 %v169_v24 }
  0x99   :  { %v134_v30 = vpop.f32.mrf.mxu1 }
  0x9a   :  { %v167_v31 = vadd.f32 %v250_v29, %v134_v30 }
  0x9c   :  { %v168_v32 = vmax.f32 %v167_v31, 0.0 }
  0x9e   :  { %205 = vmatmul.f32.vlgmr.msra.gmra.mxu3 %v168_v32 }
  0xa2   :  { %v114_v34 = vpop.f32.mrf.mxu0 }
  0xa3   :  { %v161_v37 = vadd.f32 %v251_v33, %v114_v34 }
  0xa5   :  { %v162_v41 = vmax.f32 %v161_v37, 0.0 }
  0xa7   :  { %v154_v36 = vpop.f32.mrf.mxu2 }
  0xa8   :  { %v215_v39 = vadd.f32 %v253_v35, %v154_v36 }
  0xaa   :  { %v216_v44 = vmax.f32 %v215_v39, 0.0 }
 0x121   :  { %v206_v40 = vpop.f32.mrf.mxu3 }
 0x122   :  { %v207_v42 = vadd.f32 %v252_v38, %v206_v40 }
 0x124   :  { %v209_v43 = vmax.f32 %v207_v42, 0.0 }
 0x126   :  { %v210_v45 = vadd.f32 %v209_v43, %v162_v41 }
 0x128   :  { %v217_v46 = vadd.f32 %v216_v44, %v210_v45 }
 0x12a   :  { %218 = vst [vmem:[#allocation10] sm:$0xff] %v217_v46 }
 0x12b   :  { %229 = dma.vmem_to_hbm [thread:$0]  %s225_s16, 128, %s227_s19, [#allocation4]  }
 0x12c   :  { %380 = dma.done.wait [#allocation4], 128  }
 0x12d   :  { %381 = vsyncadd [#allocation4], 4294967168 }
 0x12e   :  { %234 = vsyncpa [#allocation3], 1 }
 0x12f   :  { %235 = vsyncpa [#allocation6], 1 }
 0x130   :  { %236 = vsyncpa [#allocation9], 1 }
 0x131   :  { %237 = vsyncpa [#allocation4], 1 }

// kernel: tpu_custom_call.1
= control target key start
LH: loop header
LB: loop body
LE: loop exit
PB: predicated region body
PF: predicated region fallthrough
CT: control target
= control target key end

     0   :  { %10 = vsyncpa [#allocation3], 0  ;;  %s442_s0 = inlined_call_operand.hbm [shape: f32[8,32], index: 0, kind: input, shape index: {}]   ;;  %s443_s1 = inlined_call_operand.hbm [shape: f32[32,384], index: 1, kind: input, shape index: {}]   ;;  %s444_s2 = inlined_call_operand.hbm [shape: f32[1,384], index: 2, kind: input, shape index: {}]   ;;  %s445_s3 = inlined_call_operand.hbm [shape: f32[128,128], index: 3, kind: input, shape index: {}]   ;;  %s446_s4 = inlined_call_operand.vmem [shape: f32[1,128], index: 4, kind: input, shape index: {}]   ;;  %s447_s5 = inlined_call_operand.hbm [shape: f32[8,128], index: 5, kind: output, shape index: {}]  }
   0x1   :  { %11 = vsyncpa [#allocation6], 0 }
   0x2   :  { %12 = vsyncpa [#allocation9], 0  ;;  %s29_s20 = sshll.u32 %s443_s1, 4  ;;  %s30_s20 = int_to_ptr.hbm [resolvable:$true] %s29_s20 }
   0x3   :  { %13 = vsyncpa [#allocation4], 0  ;;  %s382_s21 = smov [#allocation5]   ;;  %s19_s25 = sshll.u32 %s442_s0, 4  ;;  %s20_s25 = int_to_ptr.hbm [resolvable:$true] %s19_s25 }
   0x4   :  { %s31_s22 = sshll.u32 %s382_s21, 4  ;;  %s383_s26 = smov 384   ;;  %s32_s22 = int_to_ptr.vmem [resolvable:$true] %s31_s22 }
   0x5   :  { %s384_s27 = smov 24   ;;  %s385_s28 = smov [#allocation2]  }
   0x6   :  { %37 = dma.hbm_to_vmem [thread:$0]  %s30_s20, 1536, %s32_s22, [#allocation6], %s383_s26, %s383_s26, %s384_s27  }
   0x7   :  { %s21_s29 = sshll.u32 %s385_s28, 4  ;;  %s43_s7 = sshll.u32 %s444_s2, 4  ;;  %s22_s29 = int_to_ptr.vmem [resolvable:$true] %s21_s29  ;;  %s44_s7 = int_to_ptr.hbm [resolvable:$true] %s43_s7 }
   0x8   :  { %24 = dma.hbm_to_vmem [thread:$0]  %s20_s25, 128, %s22_s29, [#allocation3]  }
   0x9   :  { %s53_s9 = sshll.u32 %s445_s3, 4  ;;  %s386_s10 = smov [#allocation7]   ;;  %s54_s9 = int_to_ptr.hbm [resolvable:$true] %s53_s9 }
   0xa   :  { %s45_s11 = sshll.u32 %s386_s10, 4  ;;  %s387_s0 = smov [#allocation8]   ;;  %s46_s11 = int_to_ptr.vmem [resolvable:$true] %s45_s11 }
   0xb   :  { %48 = dma.hbm_to_vmem [thread:$0]  %s44_s7, 48, %s46_s11, [#allocation6]  }
   0xc   :  { %s55_s12 = sshll.u32 %s387_s0, 4  ;;  %s388_s13 = smov 128   ;;  %s56_s12 = int_to_ptr.vmem [resolvable:$true] %s55_s12 }
   0xd   :  { %s389_s14 = smov 8  }
   0xe   :  { %61 = dma.hbm_to_vmem [thread:$0]  %s54_s9, 2048, %s56_s12, [#allocation9], %s388_s13, %s388_s13, %s389_s14  }
   0xf   :  { %374 = dma.done.wait [#allocation3], 128  }
  0x10   :  { %375 = vsyncadd [#allocation3], 4294967168 }
  0x11   :  { %376 = dma.done.wait [#allocation6], 1584  }
  0x12   :  { %377 = vsyncadd [#allocation6], 4294965712 }
  0x13   :  { %378 = dma.done.wait [#allocation9], 2048  }
  0x14   :  { %379 = vsyncadd [#allocation9], 4294965248  ;;  %v90_v0 = vld [vmem:[#allocation5 + $0x50] sm:$0xff]  ;;  %v87_v1 = vld [vmem:[#allocation5 + $0x38] sm:$0xff]  ;;  %vm93_vm0 = vcmask 261120   ;;  %s390_s15 = smov [#allocation10]  }
  0x15   :  { %129 = vmatpush.msra.mxu1 %v90_v0  ;;  %v184_v2 = vld [vmem:[#allocation8 + $0x78] sm:$0xff]  ;;  %v183_v4 = vld [vmem:[#allocation8 + $0x70] sm:$0xff]  ;;  %v182_v5 = vld [vmem:[#allocation8 + $0x68] sm:$0xff]  ;;  %s224_s16 = sshll.u32 %s390_s15, 4  ;;  %s226_s19 = sshll.u32 %s447_s5, 4  ;;  %s225_s16 = int_to_ptr.vmem [resolvable:$true] %s224_s16  ;;  %s227_s19 = int_to_ptr.hbm [resolvable:$true] %s226_s19 }
  0x16   :  { %v84_v3 = vld [vmem:[#allocation5 + $0x20] sm:$0xff]  ;;  %189 = vmatpush.msra.mxu3 %v184_v2  ;;  %v81_v6 = vld [vmem:[#allocation5 + $0x8] sm:$0xff]  ;;  %v92_v7 = vld [vmem:[#allocation2] sm:$0xff] }
  0x17   :  { %130 = vmatpush.msra.mxu1 %v87_v1  ;;  %v181_v8 = vld [vmem:[#allocation8 + $0x60] sm:$0xff]  ;;  %v180_v9 = vld [vmem:[#allocation8 + $0x58] sm:$0xff]  ;;  %v179_v10 = vld [vmem:[#allocation8 + $0x50] sm:$0xff] }
  0x18   :  { %190 = vmatpush.msra.mxu3 %v183_v4  ;;  %v178_v11 = vld [vmem:[#allocation8 + $0x48] sm:$0xff]  ;;  %v177_v12 = vld [vmem:[#allocation8 + $0x40] sm:$0xff]  ;;  %v176_v13 = vld [vmem:[#allocation8 + $0x38] sm:$0xff] }
  0x19   :  { %131 = vmatpush.msra.mxu1 %v84_v3  ;;  %v175_v14 = vld [vmem:[#allocation8 + $0x30] sm:$0xff]  ;;  %v174_v15 = vld [vmem:[#allocation8 + $0x28] sm:$0xff]  ;;  %v173_v16 = vld [vmem:[#allocation8 + $0x20] sm:$0xff] }
  0x1a   :  { %191 = vmatpush.msra.mxu3 %v182_v5  ;;  %v172_v17 = vld [vmem:[#allocation8 + $0x18] sm:$0xff]  ;;  %v171_v19 = vld [vmem:[#allocation8 + $0x10] sm:$0xff]  ;;  %v170_v21 = vld [vmem:[#allocation8 + $0x8] sm:$0xff] }
  0x1b   :  { %132 = vmatpush.msra.mxu1 %v81_v6  ;;  %v91_v18 = vld [vmem:[#allocation5 + $0x58] sm:$0xff]  ;;  %v88_v20 = vld [vmem:[#allocation5 + $0x40] sm:$0xff]  ;;  %v89_v22 = vld [vmem:[#allocation5 + $0x48] sm:$0xff] }
  0x1c   :  { %239 = vmatmul.msk.f32.vlgmr.msra.gmra.mxu1 %vm93_vm0, %v92_v7  ;;  %192 = vmatpush.msra.mxu3 %v181_v8  ;;  %v85_v23 = vld [vmem:[#allocation5 + $0x28] sm:$0xff]  ;;  %v86_v25 = vld [vmem:[#allocation5 + $0x30] sm:$0xff]  ;;  %v83_v27 = vld [vmem:[#allocation5 + $0x18] sm:$0xff] }
  0x1d   :  { %149 = vmatpush.msra.mxu2 %v91_v18  ;;  %v169_v24 = vld [vmem:[#allocation8] sm:$0xff]  ;;  %109 = vmatpush.msra.mxu0 %v89_v22  ;;  %v82_v26 = vld [vmem:[#allocation5 + $0x10] sm:$0xff]  ;;  %v250_v29 = vld [vmem:[#allocation7 + $0x1] ss:$0 sm:$0xff] }
  0x1e   :  { %193 = vmatpush.msra.mxu3 %v180_v9  ;;  %v80_v28 = vld [vmem:[#allocation5] sm:$0xff]  ;;  %v252_v38 = vld [vmem:[%s446_s4] ss:$0 sm:$0xff] }
  0x1f   :  { %150 = vmatpush.msra.mxu2 %v88_v20  ;;  %110 = vmatpush.msra.mxu0 %v86_v25  ;;  %v251_v33 = vld [vmem:[#allocation7] ss:$0 sm:$0xff]  ;;  %v253_v35 = vld [vmem:[#allocation7 + $0x2] ss:$0 sm:$0xff] }
  0x20   :  { %194 = vmatpush.msra.mxu3 %v179_v10 }
  0x21   :  { %151 = vmatpush.msra.mxu2 %v85_v23  ;;  %111 = vmatpush.msra.mxu0 %v83_v27 }
  0x22   :  { %195 = vmatpush.msra.mxu3 %v178_v11 }
  0x23   :  { %152 = vmatpush.msra.mxu2 %v82_v26  ;;  %112 = vmatpush.msra.mxu0 %v80_v28 }
  0x24   :  { %196 = vmatpush.msra.mxu3 %v177_v12  ;;  %240 = vmatmul.msk.f32.vlgmr.msra.gmra.mxu2 %vm93_vm0, %v92_v7 }
  0x25   :  { %238 = vmatmul.msk.f32.vlgmr.msra.gmra.mxu0 %vm93_vm0, %v92_v7 }
  0x26   :  { %197 = vmatpush.msra.mxu3 %v176_v13 }
  0x28   :  { %198 = vmatpush.msra.mxu3 %v175_v14 }
  0x2a   :  { %199 = vmatpush.msra.mxu3 %v174_v15 }
  0x2c   :  { %200 = vmatpush.msra.mxu3 %v173_v16 }
  0x2e   :  { %201 = vmatpush.msra.mxu3 %v172_v17 }
  0x30   :  { %202 = vmatpush.msra.mxu3 %v171_v19 }
  0x32   :  { %203 = vmatpush.msra.mxu3 %v170_v21 }
  0x34   :  { %204 = vmatpush.msra.mxu3 %v169_v24 }
  0x99   :  { %v134_v30 = vpop.f32.mrf.mxu1 }
  0x9a   :  { %v167_v31 = vadd.f32 %v250_v29, %v134_v30 }
  0x9c   :  { %v168_v32 = vmax.f32 %v167_v31, 0.0 }
  0x9e   :  { %205 = vmatmul.f32.vlgmr.msra.gmra.mxu3 %v168_v32 }
  0xa2   :  { %v114_v34 = vpop.f32.mrf.mxu0 }
  0xa3   :  { %v161_v37 = vadd.f32 %v251_v33, %v114_v34 }
  0xa5   :  { %v162_v41 = vmax.f32 %v161_v37, 0.0 }
  0xa7   :  { %v154_v36 = vpop.f32.mrf.mxu2 }
  0xa8   :  { %v215_v39 = vadd.f32 %v253_v35, %v154_v36 }
  0xaa   :  { %v216_v44 = vmax.f32 %v215_v39, 0.0 }
 0x121   :  { %v206_v40 = vpop.f32.mrf.mxu3 }
 0x122   :  { %v207_v42 = vadd.f32 %v252_v38, %v206_v40 }
 0x124   :  { %v209_v43 = vmax.f32 %v207_v42, 0.0 }
 0x126   :  { %v210_v45 = vadd.f32 %v209_v43, %v162_v41 }
 0x128   :  { %v217_v46 = vadd.f32 %v216_v44, %v210_v45 }
 0x12a   :  { %218 = vst [vmem:[#allocation10] sm:$0xff] %v217_v46 }
 0x12b   :  { %229 = dma.vmem_to_hbm [thread:$0]  %s225_s16, 128, %s227_s19, [#allocation4]  }
 0x12c   :  { %380 = dma.done.wait [#allocation4], 128  }
 0x12d   :  { %381 = vsyncadd [#allocation4], 4294967168 }
 0x12e   :  { %234 = vsyncpa [#allocation3], 1 }
 0x12f   :  { %235 = vsyncpa [#allocation6], 1 }
 0x130   :  { %236 = vsyncpa [#allocation9], 1 }
 0x131   :  { %237 = vsyncpa [#allocation4], 1 }

</bundles_post_ra>
